<compile_context>
chip_gen: v7x
topology: tpu7x:2x2x1
jax: 0.10.0
libtpu: 0.0.40
codegen_flags: <defaults>
</compile_context>

<pallas_src>
import jax
import jax.numpy as jnp
from jax.experimental import pallas as pl
from jax.experimental.pallas import tpu as pltpu


def _round_up(x: int, m: int) -> int:
    return ((x + m - 1) // m) * m


def _vmem_caps(budget_override, limit_override):
    """Chip-aware VMEM shrink budget and Mosaic scoped limit (bytes)."""
    try:
        cap = int(pltpu.get_tpu_info().vmem_capacity_bytes)
    except Exception:
        cap = 0
    if cap <= 0:
        cap = 64 * 1024 * 1024          # conservative default: v7x-sized per-TC VMEM
    budget = budget_override if budget_override is not None else min(cap // 2, 64 * 1024 * 1024)
    limit = limit_override if limit_override is not None else min((cap * 3) // 4, 96 * 1024 * 1024)
    return int(budget), int(max(limit, budget))


def _choose_k(E: int, max_tile_k: int = 1024):
    """Pick the contraction tile.  Returns (tile_k, E_pad, grid_k)."""
    if E <= max_tile_k:
        return E, E, 1                   # whole contraction fits in one block
    # Prefer a lane-aligned exact divisor of E: no K padding, no extra weight copy.
    best, tk = 0, 128
    while tk <= min(2 * max_tile_k, E):
        if E % tk == 0:
            best = tk
        tk += 128
    if best >= 512:
        return best, E, E // best
    # No good divisor: zero-pad K (zeros add nothing to the contraction).
    tile_k = max_tile_k
    E_pad = _round_up(E, tile_k)
    return tile_k, E_pad, E_pad // tile_k


def _divisor_tiles(padded: int, gran: int, cap: int):
    """Multiples of `gran` that divide `padded`, capped, largest first."""
    cap = min(cap, padded)
    return sorted([t for t in range(gran, cap + 1, gran) if padded % t == 0], reverse=True)


def _decoder_kernel(x_ref, w_ref, b_ref, o_ref):
    # Full contraction in one block: MXU matmul (f32 accumulate), VPU bias add, EUP sigmoid.
    y = jnp.dot(x_ref[...], w_ref[...], preferred_element_type=jnp.float32)
    y = y + b_ref[...].astype(jnp.float32)          # (1, tile_n) broadcasts over rows
    o_ref[...] = jax.nn.sigmoid(y).astype(o_ref.dtype)


def _decoder_kernel_ktiled(x_ref, w_ref, b_ref, o_ref, acc_ref):
    # K-tiled contraction: f32 accumulator scratch, bias + sigmoid on the last K step.
    k = pl.program_id(2)

    @pl.when(k == 0)
    def _init():
        acc_ref[...] = jnp.zeros_like(acc_ref)

    acc_ref[...] += jnp.dot(x_ref[...], w_ref[...], preferred_element_type=jnp.float32)

    @pl.when(k == pl.num_programs(2) - 1)
    def _finalize():
        y = acc_ref[...] + b_ref[...].astype(jnp.float32)
        o_ref[...] = jax.nn.sigmoid(y).astype(o_ref.dtype)


def decoder_forward(x, w_t, b, *,
                    max_tile_m=512, max_tile_n=2048, max_tile_k=1024,
                    compute_dtype=None,
                    vmem_budget_bytes=None, vmem_limit_bytes=None,
                    allow_xla_fallback=True,
                    allow_deep_buffering=True):
    """sigmoid(x @ w_t + b) via a tiled Pallas TPU kernel.

    x:   (B, E)
    w_t: (E, O)   (transpose of the PyTorch (O, E) nn.Linear weight)
    b:   (O,)

    compute_dtype: optionally cast x / w_t (e.g. jnp.bfloat16) before the MXU matmul;
    accumulation stays f32 and bias + sigmoid stay f32.  For the HBM-bandwidth win,
    store/pass w_t in bf16 upstream rather than relying on this per-call cast.
    """
    B, E = x.shape
    E2, O = w_t.shape
    assert E2 == E and b.shape == (O,)
    out_dtype = x.dtype

    if compute_dtype is not None:
        x = x.astype(compute_dtype)
        w_t = w_t.astype(compute_dtype)

    x_item = jnp.dtype(x.dtype).itemsize
    w_item = jnp.dtype(w_t.dtype).itemsize
    b_item = jnp.dtype(b.dtype).itemsize
    out_item = jnp.dtype(out_dtype).itemsize

    vmem_budget, vmem_limit = _vmem_caps(vmem_budget_bytes, vmem_limit_bytes)

    # ---- Tile selection --------------------------------------------------------------
    tile_k, E_pad, grid_k = _choose_k(E, max_tile_k)

    # N: pad O only to a 128-lane multiple (never to tile_n); tile_n must divide O_pad,
    # so the weight is never re-padded/copied beyond that (lane-dense unmasked stores).
    O_pad = _round_up(O, 128)
    n_cands = _divisor_tiles(O_pad, 128, max_tile_n)

    # M: pad the batch to a sublane multiple; tile_m divides B_pad.  Padding x is cheap
    # relative to the weight stream, so fall back to a coarser pad if B_pad has no
    # useful divisors (e.g. 8 * large prime).
    B_pad = _round_up(B, 8)
    m_cands = _divisor_tiles(B_pad, 8, max_tile_m)
    if m_cands[0] < 64 and B_pad > 512:
        B_pad = _round_up(B, 256)
        m_cands = _divisor_tiles(B_pad, 8, max_tile_m)

    def footprint(tm, tn):
        fp = 2 * tm * tile_k * x_item        # x tiles (double buffered)
        fp += 2 * tile_k * tn * w_item       # weight tiles
        fp += 2 * tn * b_item                # bias tiles
        fp += 2 * tm * tn * out_item         # output tiles
        if grid_k > 1:
            fp += tm * tn * 4                # f32 accumulator scratch
        return fp

    # Prefer the widest (lane-dense) output tile that fits, then the tallest row tile.
    tile_m, tile_n = m_cands[-1], n_cands[-1]
    done = False
    for tn in n_cands:
        for tm in m_cands:
            if footprint(tm, tn) <= vmem_budget:
                tile_m, tile_n = tm, tn
                done = True
                break
        if done:
            break

    grid_m = B_pad // tile_m
    grid_n = O_pad // tile_n

    # ---- Degenerate problems: a single tiny block is pure launch/step overhead --------
    total_bytes = B_pad * E_pad * x_item + E_pad * O_pad * w_item + B_pad * O_pad * out_item
    if allow_xla_fallback and grid_m * grid_n * grid_k == 1 and total_bytes <= 256 * 1024:
        y = jnp.dot(x, w_t, preferred_element_type=jnp.float32) + b.astype(jnp.float32)
        return jax.nn.sigmoid(y).astype(out_dtype)

    # ---- Padding (zero-fill: K zeros add nothing; M/N pads are sliced off) ------------
    if O_pad != O:
        w_t = jnp.pad(w_t, ((0, 0), (0, O_pad - O)))
        b = jnp.pad(b, (0, O_pad - O))
    if E_pad != E:
        x = jnp.pad(x, ((0, 0), (0, E_pad - E)))
        w_t = jnp.pad(w_t, ((0, E_pad - E), (0, 0)))
    if B_pad != B:
        x = jnp.pad(x, ((0, B_pad - B), (0, 0)))
    b2d = b.reshape(1, O_pad)

    # ---- Grid ordering: the operand whose redundant re-fetch would cost more goes on
    # the OUTER axis.  In the no-K-tiling path its block index is then constant across
    # the inner axis, so Pallas DMAs it exactly once.
    x_refetch = (grid_n - 1) * B_pad * E_pad * x_item
    w_refetch = (grid_m - 1) * E_pad * O_pad * w_item
    weight_outer = w_refetch >= x_refetch

    def spec(shape, index_map, bufs=2):
        if bufs > 2 and hasattr(pl, "Buffered"):
            try:
                return pl.BlockSpec(shape, index_map, pipeline_mode=pl.Buffered(bufs))
            except TypeError:
                pass
        return pl.BlockSpec(shape, index_map)

    if grid_k == 1:
        # ---- Single-block contraction: 2-D grid, reused operand fetched once ----------
        x_bufs = w_bufs = 2
        if allow_deep_buffering:
            inner_steps = grid_m if weight_outer else grid_n
            if weight_outer and inner_steps >= 3 and \
                    footprint(tile_m, tile_n) + tile_m * tile_k * x_item <= vmem_budget:
                x_bufs = 3          # x is re-fetched every inner step: hide its DMA latency
            elif (not weight_outer) and inner_steps >= 3 and \
                    footprint(tile_m, tile_n) + tile_k * tile_n * w_item <= vmem_budget:
                w_bufs = 3

        if weight_outer:
            grid = (grid_n, grid_m)
            x_spec = spec((tile_m, E_pad), lambda j, i: (i, 0), x_bufs)
            w_spec = spec((E_pad, tile_n), lambda j, i: (0, j), w_bufs)
            b_spec = pl.BlockSpec((1, tile_n), lambda j, i: (0, j))
            o_spec = pl.BlockSpec((tile_m, tile_n), lambda j, i: (i, j))
        else:
            grid = (grid_m, grid_n)
            x_spec = spec((tile_m, E_pad), lambda i, j: (i, 0), x_bufs)
            w_spec = spec((E_pad, tile_n), lambda i, j: (0, j), w_bufs)
            b_spec = pl.BlockSpec((1, tile_n), lambda i, j: (0, j))
            o_spec = pl.BlockSpec((tile_m, tile_n), lambda i, j: (i, j))

        kernel = _decoder_kernel
        scratch = ()
        # Outer "parallel", inner "arbitrary": on v7x the megacore split lands on the
        # outer axis only, so the reused outer operand is streamed from HBM once.
        dim_sem = ("parallel", "arbitrary")
        in_bytes = (E_pad * O_pad * w_item + grid_n * B_pad * E_pad * x_item) if weight_outer \
            else (B_pad * E_pad * x_item + grid_m * E_pad * O_pad * w_item)
    else:
        # ---- K-tiled: 3-D grid (outer, inner, k) + f32 accumulator --------------------
        if weight_outer:
            grid = (grid_n, grid_m, grid_k)
            x_spec = pl.BlockSpec((tile_m, tile_k), lambda j, i, k: (i, k))
            w_spec = pl.BlockSpec((tile_k, tile_n), lambda j, i, k: (k, j))
            b_spec = pl.BlockSpec((1, tile_n), lambda j, i, k: (0, j))
            o_spec = pl.BlockSpec((tile_m, tile_n), lambda j, i, k: (i, j))
        else:
            grid = (grid_m, grid_n, grid_k)
            x_spec = pl.BlockSpec((tile_m, tile_k), lambda i, j, k: (i, k))
            w_spec = pl.BlockSpec((tile_k, tile_n), lambda i, j, k: (k, j))
            b_spec = pl.BlockSpec((1, tile_n), lambda i, j, k: (0, j))
            o_spec = pl.BlockSpec((tile_m, tile_n), lambda i, j, k: (i, j))

        kernel = _decoder_kernel_ktiled
        scratch = (pltpu.VMEM((tile_m, tile_n), jnp.float32),)
        # With the K sweep innermost both operands are re-streamed regardless of which MN
        # axis is outer, so both can be megacore-parallel; the reduction stays arbitrary.
        dim_sem = ("parallel", "parallel", "arbitrary")
        in_bytes = grid_m * E_pad * O_pad * w_item + grid_n * B_pad * E_pad * x_item

    cost = pl.CostEstimate(
        flops=2 * B_pad * E_pad * O_pad,
        transcendentals=2 * B_pad * O_pad,            # sigmoid ~ exp + reciprocal
        bytes_accessed=int(in_bytes + O_pad * b_item + B_pad * O_pad * out_item),
    )

    out_padded = pl.pallas_call(
        kernel,
        out_shape=jax.ShapeDtypeStruct((B_pad, O_pad), out_dtype),
        grid_spec=pltpu.PrefetchScalarGridSpec(
            num_scalar_prefetch=0,
            grid=grid,
            in_specs=[x_spec, w_spec, b_spec],
            out_specs=o_spec,
            scratch_shapes=scratch,
        ),
        compiler_params=pltpu.CompilerParams(
            dimension_semantics=dim_sem,
            vmem_limit_bytes=int(vmem_limit),
        ),
        cost_estimate=cost,
    )(x, w_t, b2d)

    if B_pad != B or O_pad != O:
        out_padded = out_padded[:B, :O]
    return out_padded


if __name__ == "__main__":
    key = jax.random.PRNGKey(0)

    def make_case(k, batch, embedding_size, input_size):
        kx, kw, kb = jax.random.split(k, 3)
        bound = 1.0 / (embedding_size ** 0.5)
        weight = jax.random.uniform(kw, (input_size, embedding_size),
                                    minval=-bound, maxval=bound, dtype=jnp.float32)
        bias = jax.random.uniform(kb, (input_size,),
                                  minval=-bound, maxval=bound, dtype=jnp.float32)
        x = jax.random.normal(kx, (batch, embedding_size), dtype=jnp.float32)
        return x, weight, bias

    k1, k2, k3 = jax.random.split(key, 3)

    # Case 1: shapes consistent with the module (embedding_size=32, input_size=128, batch=8).
    # allow_xla_fallback=False forces the Pallas path so the kernel itself is exercised.
    x, weight, bias = make_case(k1, batch=8, embedding_size=32, input_size=128)
    out = jax.block_until_ready(decoder_forward(x, weight.T, bias, allow_xla_fallback=False))
    ref = jax.nn.sigmoid(x @ weight.T + bias)
    assert out.shape == ref.shape
    assert jnp.allclose(out, ref, atol=1e-5, rtol=1e-5)

    # Case 2: non-aligned shapes -> exercises the 128-lane pad + divisor-tile path.
    x2, weight2, bias2 = make_case(k2, batch=5, embedding_size=24, input_size=200)
    out2 = jax.block_until_ready(decoder_forward(x2, weight2.T, bias2, allow_xla_fallback=False))
    ref2 = jax.nn.sigmoid(x2 @ weight2.T + bias2)
    assert out2.shape == ref2.shape
    assert jnp.allclose(out2, ref2, atol=1e-5, rtol=1e-5)

    # Case 3: larger embedding -> exercises the K-tiled accumulator path (grid_k > 1).
    x3, weight3, bias3 = make_case(k3, batch=16, embedding_size=2304, input_size=256)
    out3 = jax.block_until_ready(decoder_forward(x3, weight3.T, bias3, allow_xla_fallback=False))
    ref3 = jax.nn.sigmoid(x3 @ weight3.T + bias3)
    assert out3.shape == ref3.shape
    assert jnp.allclose(out3, ref3, atol=1e-4, rtol=1e-4)

    print("KERNEL_OK")
</pallas_src>

<mosaic_0001>
module attributes {stable_mosaic.version = 11 : i64} {
  func.func @_decoder_kernel(%arg0: i32, %arg1: i32, %arg2: memref<8x32xf32, #tpu.memory_space<vmem>>, %arg3: memref<32x128xf32, #tpu.memory_space<vmem>>, %arg4: memref<1x128xf32, #tpu.memory_space<vmem>>, %arg5: memref<8x128xf32, #tpu.memory_space<vmem>>) attributes {dimension_semantics = [#tpu.dimension_semantics<parallel>, #tpu.dimension_semantics<arbitrary>], iteration_bounds = array<i64: 1, 1>, scalar_prefetch = 0 : i64, scratch_operands = 0 : i64, tpu.core_type = #tpu.core_type<tc>, window_params = [{transform_indices = @transform_0, window_bounds = array<i64: 8, 32>}, {transform_indices = @transform_1, window_bounds = array<i64: 32, 128>}, {transform_indices = @transform_2, window_bounds = array<i64: 1, 128>}, {transform_indices = @transform_3, window_bounds = array<i64: 8, 128>}]} {
    %c0 = arith.constant 0 : index
    %c0_0 = arith.constant 0 : index
    %0 = vector.load %arg2[%c0, %c0_0] : memref<8x32xf32, #tpu.memory_space<vmem>>, vector<8x32xf32>
    %c0_1 = arith.constant 0 : index
    %c0_2 = arith.constant 0 : index
    %1 = vector.load %arg3[%c0_1, %c0_2] : memref<32x128xf32, #tpu.memory_space<vmem>>, vector<32x128xf32>
    %cst = arith.constant dense<0.000000e+00> : vector<8x128xf32>
    %2 = tpu.matmul %0, %1, %cst {dimension_numbers = #tpu.dot_dimension_numbers<[1], [0], [0], [1], [0, 0, 1, 1], [], []>} : vector<8x32xf32>, vector<32x128xf32>, vector<8x128xf32> -> vector<8x128xf32>
    %c0_3 = arith.constant 0 : index
    %c0_4 = arith.constant 0 : index
    %3 = vector.load %arg4[%c0_3, %c0_4] : memref<1x128xf32, #tpu.memory_space<vmem>>, vector<1x128xf32>
    %4 = vector.broadcast %3 : vector<1x128xf32> to vector<8x128xf32>
    %5 = arith.addf %2, %4 : vector<8x128xf32>
    %6 = arith.negf %5 : vector<8x128xf32>
    %7 = math.exp %6 : vector<8x128xf32>
    %cst_5 = arith.constant 1.000000e+00 : f32
    %8 = vector.broadcast %cst_5 : f32 to vector<8x128xf32>
    %9 = arith.addf %8, %7 : vector<8x128xf32>
    %10 = arith.divf %8, %9 : vector<8x128xf32>
    %c0_6 = arith.constant 0 : index
    %c0_7 = arith.constant 0 : index
    %11 = vector.load %arg5[%c0_6, %c0_7] : memref<8x128xf32, #tpu.memory_space<vmem>>, vector<8x128xf32>
    tpu.vector_store %arg5[%c0_6, %c0_7], %10 {strides = array<i32>} : memref<8x128xf32, #tpu.memory_space<vmem>>, vector<8x128xf32>,
    return
  }
  func.func @transform_0(%arg0: i32, %arg1: i32) -> (i32, i32) {
    %c0_i32 = arith.constant 0 : i32
    %c0_i32_0 = arith.constant 0 : i32
    return %arg1, %c0_i32 : i32, i32
  }
  func.func @transform_1(%arg0: i32, %arg1: i32) -> (i32, i32) {
    %c0_i32 = arith.constant 0 : i32
    %c0_i32_0 = arith.constant 0 : i32
    return %c0_i32, %arg0 : i32, i32
  }
  func.func @transform_2(%arg0: i32, %arg1: i32) -> (i32, i32) {
    %c0_i32 = arith.constant 0 : i32
    %c0_i32_0 = arith.constant 0 : i32
    return %c0_i32, %arg0 : i32, i32
  }
  func.func @transform_3(%arg0: i32, %arg1: i32) -> (i32, i32) {
    %c0_i32 = arith.constant 0 : i32
    return %arg1, %arg0 : i32, i32
  }
}

</mosaic_0001>

<bundles_post_ra>
// kernel: tpu_custom_call.1
= control target key start
LH: loop header
LB: loop body
LE: loop exit
PB: predicated region body
PF: predicated region fallthrough
CT: control target
= control target key end

     0   :  { %8 = vsyncpa [#allocation3], 0  ;;  %s333_s0 = inlined_call_operand.hbm [shape: f32[8,32], index: 0, kind: input, shape index: {}]   ;;  %s334_s1 = inlined_call_operand.hbm [shape: f32[32,128], index: 1, kind: input, shape index: {}]   ;;  %s335_s2 = inlined_call_operand.vmem [shape: f32[1,128], index: 2, kind: input, shape index: {}]   ;;  %s336_s3 = inlined_call_operand.hbm [shape: f32[8,128], index: 3, kind: output, shape index: {}]  }
   0x1   :  { %9 = vsyncpa [#allocation6], 0 }
   0x2   :  { %10 = vsyncpa [#allocation4], 0  ;;  %s259_s12 = smov [#allocation2]   ;;  %s260_s14 = smov [#allocation5]  }
   0x3   :  { %s17_s13 = sshll.u32 %s259_s12, 4  ;;  %s26_s15 = sshll.u32 %s260_s14, 4  ;;  %s18_s13 = int_to_ptr.vmem [resolvable:$true] %s17_s13  ;;  %s287_s15 = int_to_ptr.vmem [resolvable:$true] %s26_s15 }
   0x4   :  { %s187_s18 = scalar_lea.hbm %s333_s0, 128 }
   0x5   :  { %p188_p0 = scmp.ne.s32.totalorder %s333_s0, %s187_s18  ;;  %p191_p1 = scmp.lt.u32.totalorder %s187_s18, %s333_s0 }
   0x7   :  { %p193_p2 = pnand %p191_p1, %p188_p0 }
   0x9   :  { %196 = shalt.err (!%p193_p2)
}
   0xa   :  { %s197_s23 = scalar_lea.vmem %s18_s13, 128  ;;  %p202_p4 = scmp.lt.s32.totalorder %s18_s13, %s18_s13 }
   0xb   :  { %p198_p3 = scmp.ne.s32.totalorder %s18_s13, %s197_s23  ;;  %p203_p5 = scmp.lt.s32.totalorder %s197_s23, %s197_s23 }
   0xd   :  { %p204_p6 = por %p203_p5, %p202_p4 }
   0xf   :  { %p205_p7 = pnand %p204_p6, %p198_p3 }
  0x11   :  { %208 = shalt.err (!%p205_p7)
}
  0x12   :  { %20 = dma.hbm_to_vmem [thread:$0]  %s333_s0, 128, %s18_s13, [#allocation3]  }
  0x13   :  { %s209_s28 = scalar_lea.hbm %s334_s1, 512 }
  0x14   :  { %p210_p8 = scmp.ne.s32.totalorder %s334_s1, %s209_s28  ;;  %p213_p9 = scmp.lt.u32.totalorder %s209_s28, %s334_s1 }
  0x16   :  { %p215_p10 = pnand %p213_p9, %p210_p8 }
  0x18   :  { %218 = shalt.err (!%p215_p10)
}
  0x19   :  { %s219_s6 = scalar_lea.vmem %s287_s15, 512  ;;  %p224_p12 = scmp.lt.s32.totalorder %s287_s15, %s287_s15 }
  0x1a   :  { %p220_p11 = scmp.ne.s32.totalorder %s287_s15, %s219_s6  ;;  %p225_p13 = scmp.lt.s32.totalorder %s219_s6, %s219_s6 }
  0x1c   :  { %p226_p0 = por %p225_p13, %p224_p12 }
  0x1e   :  { %p227_p1 = pnand %p226_p0, %p220_p11 }
  0x20   :  { %230 = shalt.err (!%p227_p1)
}
  0x21   :  { %s261_s0 = smov 128   ;;  %s262_s7 = smov 8  }
  0x22   :  { %32 = dma.hbm_to_vmem [thread:$0]  %s334_s1, 512, %s287_s15, [#allocation6], %s261_s0, %s261_s0, %s262_s7  }
  0x23   :  { %253 = dma.done.wait [#allocation3], 128  }
  0x24   :  { %254 = vsyncadd [#allocation3], 4294967168 }
  0x25   :  { %255 = dma.done.wait [#allocation6], 512  }
  0x26   :  { %256 = vsyncadd [#allocation6], 4294966784  ;;  %v263_v0 = vmov 0.0|0.0   ;;  %vm264_vm0 = vmmov 0   ;;  %v265_v1 = vmov 0.0   ;;  %v42_v2 = vld [vmem:[#allocation5] sm:$0xff] }
  0x27   :  { %169 = vmatprep.subr.bf16.mxu0 %v263_v0  ;;  %166 = vmatprep.mubr.msk.f32.mxu0 %vm264_vm0, %v265_v1  ;;  %v43_v3 = vld [vmem:[#allocation5 + $0x8] sm:$0xff]  ;;  %v44_v4 = vld [vmem:[#allocation5 + $0x10] sm:$0xff]  ;;  %v45_v6 = vld [vmem:[#allocation5 + $0x18] sm:$0xff]  ;;  %vm53_vm1 = vcmask 261120   ;;  %s266_s11 = smov [#allocation7]  }
  0x28   :  { %v170_v5 = vpack.c.bf16 %v43_v3, %v42_v2  ;;  %v173_v7 = vpack.c.bf16 %v45_v6, %v44_v4  ;;  %v41_v8 = vld [vmem:[#allocation2] sm:$0xff]  ;;  %s140_s12 = sshll.u32 %s266_s11, 4  ;;  %s141_s12 = int_to_ptr.vmem [resolvable:$true] %s140_s12 }
  0x29   :  { %v150_v9 = vld [vmem:[%s335_s2] ss:$0 sm:$0xff]  ;;  %s231_s13 = scalar_lea.vmem %s141_s12, 128  ;;  %p236_p3 = scmp.lt.s32.totalorder %s141_s12, %s141_s12 }
  0x2a   :  { %171 = vmatpush3.bf16.msra.mxu0 %v170_v5  ;;  %p232_p2 = scmp.ne.s32.totalorder %s141_s12, %s231_s13  ;;  %p237_p4 = scmp.lt.s32.totalorder %s231_s13, %s231_s13 }
  0x2b   :  { %172 = vmatprep.subr.bf16.mxu0 %v263_v0 }
  0x2c   :  { %p238_p5 = por %p237_p4, %p236_p3 }
  0x2e   :  { %174 = vmatpush3.bf16.msra.mxu0 %v173_v7  ;;  %p239_p6 = pnand %p238_p5, %p232_p2 }
  0x31   :  { %167 = vmatmul.mubr.msk.f32.vlgmr.msra.gmra.mrb[0].mxu0 %vm53_vm1, %v41_v8 }
 0x104   :  { %v123_v10 = vpop.f32.mrb[0].mxu0 }
 0x105   :  { %v124_v11 = vadd.f32 %v150_v9, %v123_v10  ;;  %v168_v12 = vpop.f32.mrb[1].mxu0 }
 0x107   :  { %v152_v13 = vmul.f32 -1.442695, %v124_v11 }
 0x109   :  { %183 = vpow2.f32 %v152_v13 }
 0x113   :  { %v184_v14 = vpop.eup %183 }
 0x114   :  { %v130_v15 = vadd.f32 1.0, %v184_v14 }
 0x116   :  { %185 = vrcp.f32 %v130_v15 }
 0x120   :  { %v186_v16 = vpop.eup %185 }
 0x121   :  { %133 = vst [vmem:[#allocation7] sm:$0xff] %v186_v16 }
 0x122   :  { %242 = shalt.err (!%p239_p6)
}
 0x123   :  { %s243_s15 = scalar_lea.hbm %s336_s3, 128 }
 0x124   :  { %p244_p7 = scmp.ne.s32.totalorder %s336_s3, %s243_s15  ;;  %p247_p8 = scmp.lt.u32.totalorder %s243_s15, %s336_s3 }
 0x126   :  { %p249_p9 = pnand %p247_p8, %p244_p7 }
 0x128   :  { %252 = shalt.err (!%p249_p9)
}
 0x129   :  { %143 = dma.vmem_to_hbm [thread:$0]  %s141_s12, 128, %s336_s3, [#allocation4]  }
 0x12a   :  { %257 = dma.done.wait [#allocation4], 128  }
 0x12b   :  { %258 = vsyncadd [#allocation4], 4294967168 }
 0x12c   :  { %147 = vsyncpa [#allocation3], 1 }
 0x12d   :  { %148 = vsyncpa [#allocation6], 1 }
 0x12e   :  { %149 = vsyncpa [#allocation4], 1 }

</bundles_post_ra>
